<compile_context>
chip_gen: v6e
topology: v6e:2x2x1
jax: 0.10.0
libtpu: 0.0.40
codegen_flags: <defaults>
</compile_context>

<pallas_src>
import functools

import jax
import jax.numpy as jnp
from jax.experimental import pallas as pl
from jax.experimental.pallas import tpu as pltpu

_BN_EPS = 1e-5
_VMEM_LIMIT = 32 * 1024 * 1024  # valid scoped-VMEM request on v5e/v6e/v7x


def _pad128(c):
    return ((c + 127) // 128) * 128


# ------------------------------ Pallas kernels -------------------------------

def _mm_relu6_kernel(x_ref, w_ref, b_ref, o_ref):
    """(tm, K) @ (K, N) + folded-BN bias -> ReLU6 (stem). bf16 in, f32 acc."""
    acc = jnp.dot(x_ref[...], w_ref[...], preferred_element_type=jnp.float32)
    o_ref[...] = jnp.clip(acc + b_ref[...], 0.0, 6.0).astype(o_ref.dtype)


def _fused_block_kernel(*refs, H, W, stride, has_expand, use_res):
    """One full MobileNetV2 inverted-residual block for one image.

    expand 1x1 (+BN+ReLU6) -> depthwise 3x3 (+BN+ReLU6) -> project 1x1 (+BN)
    [+ residual].  The expanded hidden activation only ever exists in the VMEM
    scratch `hid_ref` (with a zero halo for the 3x3), never in HBM.
    """
    if has_expand:
        (x_ref, we_ref, be_ref, wd_ref, bd_ref, wp_ref, bpj_ref,
         o_ref, hid_ref) = refs
    else:
        (x_ref, wd_ref, bd_ref, wp_ref, bpj_ref, o_ref, hid_ref) = refs

    Ho = (H - 1) // stride + 1
    Wo = (W - 1) // stride + 1
    Ch = hid_ref.shape[-1]

    x2 = x_ref[...]                                         # (H*W, Cin_p) bf16
    if has_expand:
        h = jnp.dot(x2, we_ref[...], preferred_element_type=jnp.float32)
        h = jnp.clip(h + be_ref[...], 0.0, 6.0).astype(jnp.bfloat16)
    else:
        h = x2                                              # t == 1: no expand layer

    # Zero-padded hidden (halo of 1) kept entirely in VMEM.
    hid_ref[...] = jnp.zeros_like(hid_ref)
    hid_ref[1:H + 1, 1:W + 1, :] = h.reshape(H, W, Ch)

    # Depthwise 3x3: bf16 tap * bf16 weight multiplies, f32 accumulation.
    acc = jnp.zeros((Ho, Wo, Ch), jnp.float32)
    if stride == 1:
        for kh in range(3):
            strip = hid_ref[kh:kh + Ho, :, :]               # aligned row strip
            for kw in range(3):
                tap = strip[:, kw:kw + Wo, :]
                acc = acc + tap * wd_ref[kh * 3 + kw, :].reshape(1, 1, Ch)
    else:
        for kh in range(3):
            for kw in range(3):
                tap = hid_ref[pl.ds(kh, Ho, stride=2),
                              pl.ds(kw, Wo, stride=2), :]
                acc = acc + tap * wd_ref[kh * 3 + kw, :].reshape(1, 1, Ch)
    acc = jnp.clip(acc + bd_ref[0, :].reshape(1, 1, Ch), 0.0, 6.0)

    # Project 1x1 (linear bottleneck) with the residual add fused in.
    pin = acc.reshape(Ho * Wo, Ch).astype(jnp.bfloat16)
    out = jnp.dot(pin, wp_ref[...], preferred_element_type=jnp.float32)
    out = out + bpj_ref[...]
    if use_res:
        out = out + x2.astype(jnp.float32)
    o_ref[...] = out.astype(o_ref.dtype)


def _head_pool_cls_kernel(x_ref, wh_ref, bh_ref, wc_ref, bc_ref, o_ref, *, HW):
    """Fused head 1x1 conv (->1280, ReLU6) + global avg pool + classifier."""
    N, _ = o_ref.shape
    Cin = x_ref.shape[-1]
    Chead = wh_ref.shape[-1]
    x2 = x_ref[...].reshape(N * HW, Cin)
    h = jnp.dot(x2, wh_ref[...], preferred_element_type=jnp.float32)
    h = jnp.clip(h + bh_ref[...], 0.0, 6.0)
    pooled = jnp.mean(h.reshape(N, HW, Chead), axis=1)      # global average pool
    # TODO(synk): nn.Dropout(p=0.2) is identity in inference mode (no RNG mask).
    logits = jnp.dot(pooled.astype(jnp.bfloat16), wc_ref[...],
                     preferred_element_type=jnp.float32)
    o_ref[...] = logits + bc_ref[...]


# ------------------------------ Pallas wrappers -------------------------------

def _pick_tile_m(m, target=256):
    """Largest multiple-of-8 divisor of m that is <= target (else full m)."""
    if m <= target or m % 8:
        return m
    t = (target // 8) * 8
    while t >= 8:
        if m % t == 0:
            return t
        t -= 8
    # TODO(synk): non-divisible M should use pl.cdiv + a masked last tile
    # instead of one full-M tile (matters for v7x's 64 MiB VMEM at large sizes).
    return m


def stem_conv3x3_bn_relu6(x, p, *, stride=2):
    """Stem 3x3/s2 conv via XLA-side im2col of the tiny 3-channel input + tiled matmul.

    TODO(synk): at large resolutions form the 9 taps inside a kernel like the
    fused blocks do; at 32x32 the 27-column im2col tensor is negligible.
    """
    N, H, W, C = x.shape
    Ho = (H - 1) // stride + 1
    Wo = (W - 1) // stride + 1
    xp = jnp.pad(x, ((0, 0), (1, 1), (1, 1), (0, 0)))
    taps = [xp[:, kh:kh + stride * (Ho - 1) + 1:stride,
               kw:kw + stride * (Wo - 1) + 1:stride, :]
            for kh in range(3) for kw in range(3)]
    col = jnp.stack(taps, axis=3).reshape(N * Ho * Wo, 9 * C)
    Kp, Cout = p['w'].shape
    col = jnp.pad(col, ((0, 0), (0, Kp - 9 * C))).astype(jnp.bfloat16)  # lane-dense K
    M = col.shape[0]
    tm = _pick_tile_m(M)
    y = pl.pallas_call(
        _mm_relu6_kernel,
        out_shape=jax.ShapeDtypeStruct((M, Cout), jnp.bfloat16),
        grid=(M // tm,),
        in_specs=[pl.BlockSpec((tm, Kp), lambda i: (i, 0)),
                  pl.BlockSpec((Kp, Cout), lambda i: (0, 0)),
                  pl.BlockSpec((1, Cout), lambda i: (0, 0))],
        out_specs=pl.BlockSpec((tm, Cout), lambda i: (i, 0)),
        compiler_params=pltpu.CompilerParams(
            dimension_semantics=("parallel",),
            vmem_limit_bytes=_VMEM_LIMIT),
    )(col, p['w'], p['b'])
    return y.reshape(N, Ho * Wo, Cout), Ho, Wo


def fused_inverted_residual(x, blk, H, W):
    """One inverted-residual block as a single pallas_call (grid over batch)."""
    N, HW, Cin_p = x.shape
    assert HW == H * W
    stride = blk['stride']
    Ho = (H - 1) // stride + 1
    Wo = (W - 1) // stride + 1
    has_expand = blk['expand'] is not None
    Ch = blk['dw']['w'].shape[1]
    Cout_p = blk['project']['w'].shape[1]

    # TODO(synk): grid-invariant weight specs could use pipeline_mode=pl.Buffered(1)
    # to halve their double-buffered VMEM footprint (v7x headroom).
    in_specs = [pl.BlockSpec((None, HW, Cin_p), lambda n: (n, 0, 0))]
    args = [x]
    if has_expand:
        in_specs += [pl.BlockSpec((Cin_p, Ch), lambda n: (0, 0)),
                     pl.BlockSpec((1, Ch), lambda n: (0, 0))]
        args += [blk['expand']['w'], blk['expand']['b']]
    in_specs += [pl.BlockSpec((9, Ch), lambda n: (0, 0)),
                 pl.BlockSpec((1, Ch), lambda n: (0, 0)),
                 pl.BlockSpec((Ch, Cout_p), lambda n: (0, 0)),
                 pl.BlockSpec((1, Cout_p), lambda n: (0, 0))]
    args += [blk['dw']['w'], blk['dw']['b'],
             blk['project']['w'], blk['project']['b']]

    kernel = functools.partial(_fused_block_kernel, H=H, W=W, stride=stride,
                               has_expand=has_expand, use_res=blk['use_res'])
    y = pl.pallas_call(
        kernel,
        out_shape=jax.ShapeDtypeStruct((N, Ho * Wo, Cout_p), jnp.bfloat16),
        grid=(N,),
        in_specs=in_specs,
        out_specs=pl.BlockSpec((None, Ho * Wo, Cout_p), lambda n: (n, 0, 0)),
        scratch_shapes=[pltpu.VMEM((H + 2, W + 2, Ch), jnp.bfloat16)],
        compiler_params=pltpu.CompilerParams(
            dimension_semantics=("parallel",),
            vmem_limit_bytes=_VMEM_LIMIT),
    )(*args)
    return y, Ho, Wo


def head_pool_classifier(x, head_p, cls_w, cls_b, HW):
    """Fused head conv + global average pool + Linear(1280, num_classes)."""
    N, _, Cin_p = x.shape
    Chead = head_p['w'].shape[1]
    NCp = cls_w.shape[1]
    return pl.pallas_call(
        functools.partial(_head_pool_cls_kernel, HW=HW),
        out_shape=jax.ShapeDtypeStruct((N, NCp), jnp.float32),
        grid=(1,),
        in_specs=[pl.BlockSpec((N, HW, Cin_p), lambda i: (0, 0, 0)),
                  pl.BlockSpec((Cin_p, Chead), lambda i: (0, 0)),
                  pl.BlockSpec((1, Chead), lambda i: (0, 0)),
                  pl.BlockSpec((Chead, NCp), lambda i: (0, 0)),
                  pl.BlockSpec((1, NCp), lambda i: (0, 0))],
        out_specs=pl.BlockSpec((N, NCp), lambda i: (0, 0)),
        compiler_params=pltpu.CompilerParams(
            dimension_semantics=("arbitrary",),
            vmem_limit_bytes=_VMEM_LIMIT),
    )(x, head_p['w'], head_p['b'], cls_w, cls_b)


# --------------------------- parameter construction --------------------------

class _KeyGen:
    def __init__(self, seed):
        self._key = jax.random.PRNGKey(seed)

    def __call__(self):
        self._key, k = jax.random.split(self._key)
        return k


def _fold_bn(w, gamma, beta):
    # TODO(synk): eval-mode BN folding assumes running_mean=0, running_var=1 (valid
    # for this synthetic init only); a real checkpoint needs gamma/sqrt(var+eps) and
    # beta - mean*scale.
    scale = gamma / jnp.sqrt(1.0 + _BN_EPS)
    return w * scale, beta


def _init_conv_bn(kg, kin, cout, *, kin_pad):
    """Conv(+BN folded) weights, zero-padded to lane-dense (kin_pad, cout_pad)."""
    cout_pad = _pad128(cout)
    w = 0.05 * jax.random.normal(kg(), (kin, cout), jnp.float32)
    gamma = 1.0 + 0.05 * jax.random.normal(kg(), (cout,), jnp.float32)
    beta = 0.05 * jax.random.normal(kg(), (cout,), jnp.float32)
    w, b = _fold_bn(w, gamma, beta)
    wp = jnp.zeros((kin_pad, cout_pad), jnp.float32).at[:kin, :cout].set(w)
    bp = jnp.zeros((1, cout_pad), jnp.float32).at[0, :cout].set(b)
    return {'w': wp.astype(jnp.bfloat16), 'b': bp}


def _init_dw_bn(kg, c, c_pad):
    w = 0.05 * jax.random.normal(kg(), (9, c), jnp.float32)
    gamma = 1.0 + 0.05 * jax.random.normal(kg(), (c,), jnp.float32)
    beta = 0.05 * jax.random.normal(kg(), (c,), jnp.float32)
    w, b = _fold_bn(w, gamma, beta)
    wp = jnp.zeros((9, c_pad), jnp.float32).at[:, :c].set(w)
    bp = jnp.zeros((1, c_pad), jnp.float32).at[0, :c].set(b)
    return {'w': wp.astype(jnp.bfloat16), 'b': bp}


# torchvision MobileNetV2 inverted-residual setting: (expansion, out_ch, repeats, stride)
_INVERTED_RESIDUAL_CFG = [
    (1, 16, 1, 1), (6, 24, 2, 2), (6, 32, 3, 2), (6, 64, 4, 2),
    (6, 96, 3, 1), (6, 160, 3, 2), (6, 320, 1, 1),
]


def init_mobilenet_captioning_params(seed=0, num_classes=4):
    # TODO(synk): weights are deterministic synthetic values, not the pretrained
    # MobileNet_V2_Weights.DEFAULT checkpoint (no file loading allowed).
    kg = _KeyGen(seed)
    params = {'stem': _init_conv_bn(kg, 27, 32, kin_pad=128)}
    blocks = []
    cin, cin_p = 32, _pad128(32)
    for t, c, n, s in _INVERTED_RESIDUAL_CFG:
        for i in range(n):
            stride = s if i == 0 else 1
            hidden = cin * t
            hidden_p = _pad128(hidden)
            blocks.append({
                'expand': _init_conv_bn(kg, cin, hidden, kin_pad=cin_p) if t != 1 else None,
                'dw': _init_dw_bn(kg, hidden, hidden_p),
                'project': _init_conv_bn(kg, hidden, c, kin_pad=hidden_p),
                'stride': stride,
                'use_res': (stride == 1 and cin == c),
            })
            cin, cin_p = c, _pad128(c)
    params['blocks'] = blocks
    params['head'] = _init_conv_bn(kg, cin, 1280, kin_pad=cin_p)
    ncp = _pad128(num_classes)
    cw = 0.05 * jax.random.normal(kg(), (1280, num_classes), jnp.float32)
    params['cls_w'] = (jnp.zeros((1280, ncp), jnp.float32)
                       .at[:, :num_classes].set(cw).astype(jnp.bfloat16))
    params['cls_b'] = jnp.zeros((1, ncp), jnp.float32)
    return params


# --------------------------------- forward -----------------------------------

def mobilenet_captioning_forward(params, x_nchw, *, num_classes=4):
    """Equivalent of MobileNetCaptioning.forward(x) (inference), x in NCHW."""
    x = jnp.transpose(x_nchw, (0, 2, 3, 1)).astype(jnp.float32)   # NCHW -> NHWC
    y, H, W = stem_conv3x3_bn_relu6(x, params['stem'], stride=2)  # (N, H*W, 128) bf16
    for blk in params['blocks']:
        y, H, W = fused_inverted_residual(y, blk, H, W)           # one kernel per block
    logits_p = head_pool_classifier(y, params['head'], params['cls_w'],
                                    params['cls_b'], H * W)
    # TODO(synk): on v5e, compact (un-padded) channel I/O between blocks would cut the
    # remaining bottleneck-activation HBM traffic further (lane-sparse stores tradeoff).
    return logits_p[:, :num_classes]


if __name__ == "__main__":
    num_classes = 4
    params = init_mobilenet_captioning_params(seed=0, num_classes=num_classes)
    # Small input consistent with the module: NCHW, 3 channels (MobileNetV2 stem).
    x = jax.random.normal(jax.random.PRNGKey(0), (2, 3, 32, 32), jnp.float32)
    logits = mobilenet_captioning_forward(params, x, num_classes=num_classes)
    jax.block_until_ready(logits)
    assert logits.shape == (2, num_classes)
    assert bool(jnp.all(jnp.isfinite(logits)))
    print("KERNEL_OK")
</pallas_src>

<mosaic_0001>
module attributes {stable_mosaic.version = 11 : i64} {
  func.func @_mm_relu6_kernel(%arg0: i32, %arg1: memref<256x128xbf16, #tpu.memory_space<vmem>>, %arg2: memref<128x128xbf16, #tpu.memory_space<vmem>>, %arg3: memref<1x128xf32, #tpu.memory_space<vmem>>, %arg4: memref<256x128xbf16, #tpu.memory_space<vmem>>) attributes {dimension_semantics = [#tpu.dimension_semantics<parallel>], iteration_bounds = array<i64: 2>, scalar_prefetch = 0 : i64, scratch_operands = 0 : i64, tpu.core_type = #tpu.core_type<tc>, window_params = [{transform_indices = @transform_0, window_bounds = array<i64: 256, 128>}, {pipeline_mode = #tpu.pipeline_mode<synchronous>, transform_indices = @transform_1, window_bounds = array<i64: 128, 128>}, {pipeline_mode = #tpu.pipeline_mode<synchronous>, transform_indices = @transform_2, window_bounds = array<i64: 1, 128>}, {transform_indices = @transform_3, window_bounds = array<i64: 256, 128>}]} {
    %c0 = arith.constant 0 : index
    %c0_0 = arith.constant 0 : index
    %0 = vector.load %arg1[%c0, %c0_0] : memref<256x128xbf16, #tpu.memory_space<vmem>>, vector<256x128xbf16>
    %c0_1 = arith.constant 0 : index
    %c0_2 = arith.constant 0 : index
    %1 = vector.load %arg2[%c0_1, %c0_2] : memref<128x128xbf16, #tpu.memory_space<vmem>>, vector<128x128xbf16>
    %cst = arith.constant dense<0.000000e+00> : vector<256x128xf32>
    %2 = tpu.matmul %0, %1, %cst {dimension_numbers = #tpu.dot_dimension_numbers<[1], [0], [0], [1], [0, 0, 1, 1], [], []>} : vector<256x128xbf16>, vector<128x128xbf16>, vector<256x128xf32> -> vector<256x128xf32>
    %c0_3 = arith.constant 0 : index
    %c0_4 = arith.constant 0 : index
    %3 = vector.load %arg3[%c0_3, %c0_4] : memref<1x128xf32, #tpu.memory_space<vmem>>, vector<1x128xf32>
    %4 = vector.broadcast %3 : vector<1x128xf32> to vector<256x128xf32>
    %5 = arith.addf %2, %4 : vector<256x128xf32>
    %cst_5 = arith.constant 0.000000e+00 : f32
    %cst_6 = arith.constant 6.000000e+00 : f32
    %6 = vector.broadcast %cst_5 : f32 to vector<256x128xf32>
    %7 = arith.maximumf %6, %5 : vector<256x128xf32>
    %8 = vector.broadcast %cst_6 : f32 to vector<256x128xf32>
    %9 = arith.minimumf %8, %7 : vector<256x128xf32>
    %10 = arith.truncf %9 : vector<256x128xf32> to vector<256x128xbf16>
    %c0_7 = arith.constant 0 : index
    %c0_8 = arith.constant 0 : index
    %11 = vector.load %arg4[%c0_7, %c0_8] : memref<256x128xbf16, #tpu.memory_space<vmem>>, vector<256x128xbf16>
    tpu.vector_store %arg4[%c0_7, %c0_8], %10 {strides = array<i32>} : memref<256x128xbf16, #tpu.memory_space<vmem>>, vector<256x128xbf16>,
    return
  }
  func.func @transform_0(%arg0: i32) -> (i32, i32) {
    %c0_i32 = arith.constant 0 : i32
    %c0_i32_0 = arith.constant 0 : i32
    return %arg0, %c0_i32 : i32, i32
  }
  func.func @transform_1(%arg0: i32) -> (i32, i32) {
    %c0_i32 = arith.constant 0 : i32
    %c0_i32_0 = arith.constant 0 : i32
    %c0_i32_1 = arith.constant 0 : i32
    return %c0_i32, %c0_i32_0 : i32, i32
  }
  func.func @transform_2(%arg0: i32) -> (i32, i32) {
    %c0_i32 = arith.constant 0 : i32
    %c0_i32_0 = arith.constant 0 : i32
    %c0_i32_1 = arith.constant 0 : i32
    return %c0_i32, %c0_i32_0 : i32, i32
  }
  func.func @transform_3(%arg0: i32) -> (i32, i32) {
    %c0_i32 = arith.constant 0 : i32
    %c0_i32_0 = arith.constant 0 : i32
    return %arg0, %c0_i32 : i32, i32
  }
}

</mosaic_0001>

<bundles_post_ra>
// kernel: tpu_custom_call.1
= control target key start
LH: loop header
LB: loop body
LE: loop exit
PB: predicated region body
PF: predicated region fallthrough
CT: control target
= control target key end

     0   :  { %8 = vsyncpa [#allocation3], 0  ;;  %s1675_s0 = inlined_call_operand.hbm [shape: bf16[512,128], index: 0, kind: input, shape index: {}]   ;;  %s1676_s1 = inlined_call_operand.hbm [shape: bf16[128,128], index: 1, kind: input, shape index: {}]   ;;  %s1677_s2 = inlined_call_operand.vmem [shape: f32[1,128], index: 2, kind: input, shape index: {}]   ;;  %s1678_s3 = inlined_call_operand.hbm [shape: bf16[512,128], index: 3, kind: output, shape index: {}]  }
   0x1   :  { %10 = vsyncpa [#allocation3 + $0x1], 0 }
   0x2   :  { %11 = vsyncpa [#allocation6], 0 }
   0x3   :  { %12 = vsyncpa [#allocation4], 0 }
   0x4   :  { %14 = vsyncpa [#allocation4 + $0x1], 0  ;;  %s1414_s12 = smov 0   ;;  %s1416_s13 = smov 0  }
   0x5   :  { %s1418_s14 = smov 0   ;;  %s1420_s15 = smov 0  }
   0x6 LB: > { %s1435_s16 = sadd.s32 4294967295, %s1385_s15   ;;  %s888_s17 = sadd.s32 4294967294, %s1385_s15   ;;  %s1385_s15 = sphi %s1420_s15, %s1700_s15   ;;  %s1381_s14 = sphi %s1418_s14, %s1699_s14   ;;  %s1377_s13 = sphi %s1416_s13, %s1698_s13   ;;  %s1373_s12 = sphi %s1414_s12, %s1697_s12  }
   0x7   : > { %p40_p0 = scmp.ne.s32.totalorder %s1377_s13, %s1373_s12  ;;  %p1679_p1 = scmp.eq.s32.totalorder %s1435_s16, 0 }
   0x8   : > { %p112_p3 = scmp.eq.s32.totalorder %s888_s17, 1  ;;  %p889_p5 = scmp.ge.s32.totalorder %s1385_s15, 1 }
   0x9   : > { %p1444_p4 = por %p1679_p1, %p40_p0  ;;  %p119_p7 = scmp.lt.s32.totalorder %s1385_s15, 3 }
   0xa   : > { %p1449_p6 = por %p112_p3, %p40_p0  ;;  %s1387_s21 = smov [#allocation5]  }
   0xb   : > { %s1683_s18 = scalar_select %p1444_p4, 1, 0 }
   0xc   : > { %s1684_s19 = scalar_select %p1449_p6, 1, 0 }
   0xd   : > { %p1454_p8 = pnand %p889_p5, %p119_p7  ;;  %s131_s22 = sshll.u32 %s1387_s21, 4  ;;  %s132_s22 = int_to_ptr.vmem [resolvable:$true] %s131_s22 }
   0xe   : > { %s1468_s24 = sadd.s32 1, %s1385_s15   ;;  %s27_s25 = sadd.s32 1, %s1381_s14 }
   0xf   : > { %s1685_s20 = scalar_select %p1454_p8, 1, 0 }
  0x10   : > { %p1186_p9 = pneg %p1454_p8  ;;  %s24_s26 = ssub.s32 %s1385_s15, %s1468_s24 }
  0x11   : > { %s1274_s27 = scalar_lea.vmem %s132_s22, 1024  ;;  %p1282_p5 = scmp.lt.s32.totalorder %s132_s22, %s132_s22 }
  0x12   : > { %p1463_p11 = pnand %p1186_p9, %p1679_p1  ;;  %p1275_p13 = scmp.ne.s32.totalorder %s132_s22, %s1274_s27 }
  0x13   : > { %p1283_p7 = scmp.lt.s32.totalorder %s1274_s27, %s1274_s27 }
  0x14   : > { %p1265_p12 = pneg %p1463_p11 }
  0x15   : > { %p1284_p10 = por %p1283_p7, %p1282_p5 }
  0x16   : > { %p1277_p0 = pnand %p1275_p13, %p1265_p12 }
  0x18   : > { %p1278_p3 = pneg %p1277_p0 }
  0x1a   : > { %p1285_p2 = pnand %p1284_p10, %p1278_p3 }
  0x1c   : > { %1288 = shalt.err (!%p1285_p2)
}
  0x1d   : > { %s1388_s28 = smov 64   ;;  %s1389_s29 = smov 4  }
  0x1e   : > { %1189 = dma.hbm_to_vmem [thread:$0]  (!%p1463_p11), %s1676_s1, 1024, %s132_s22, [#allocation6], %s1388_s28, %s1388_s28, %s1389_s29  }
  0x1f   : > { %p25_p2 = scmp.eq.s32.totalorder %s24_s26, 0  ;;  %p34_p9 = scmp.ne.s32.totalorder %s1381_s14, %s1377_s13 }
  0x20   : > { %p35_p10 = scmp.eq.s32.totalorder %s1385_s15, 0  ;;  %p1199_p12 = scmp.lt.s32.totalorder %s1385_s15, 2 }
  0x21   : > { %s1488_s5 = scalar_select %p25_p2, %s1381_s14, %s27_s25  }
  0x22   : > { %p36_p13 = por %p35_p10, %p34_p9  ;;  %p1687_p0 = scmp.eq.s32.totalorder %s1435_s16, 1 }
  0x23   : > { %s148_s7 = sand.u32 1, %s1381_s14   ;;  %s961_s8 = sshll.u32 %s1385_s15, 11 }
  0x24   : > { %p1492_p3 = por %p1687_p0, %p34_p9  ;;  %s892_s9 = sshll.u32 %s148_s7, 7 }
  0x25   : > { %s1501_s17 = scalar_lea.hbm %s1675_s0, %s961_s8  ;;  %s152_s21 = scalar_lea.vmem [#allocation2], %s892_s9 }
  0x26   : > { %s1688_s6 = scalar_select %p1492_p3, 1, 0 }
  0x27   : > { %s159_s22 = sshll.u32 %s152_s21, 4  ;;  %p1503_p11 = pnand %p1199_p12, %p36_p13  ;;  %s1507_s22 = int_to_ptr.vmem [resolvable:$true] %s159_s22 }
  0x28   : > { %s1509_s25 = scalar_lea.sflag [#allocation3], %s148_s7  ;;  %s1289_s26 = scalar_lea.hbm %s1501_s17, 2048 }
  0x29   : > { %p1290_p5 = scmp.ne.s32.totalorder %s1501_s17, %s1289_s26  ;;  %p1291_p7 = pneg %p1503_p11 }
  0x2a   : > { %s1294_s4 = scalar_lea.hbm %s1675_s0, 4096  ;;  %p1295_p10 = scmp.lt.s32.totalorder %s1501_s17, %s1675_s0 }
  0x2b   : > { %p1292_p2 = pnand %p1291_p7, %p1290_p5  ;;  %p1296_p12 = scmp.lt.s32.totalorder %s1294_s4, %s1289_s26 }
  0x2d   : > { %p1293_p9 = pneg %p1292_p2  ;;  %p1297_p13 = por %p1296_p12, %p1295_p10 }
  0x2f   : > { %p1298_p0 = pnand %p1297_p13, %p1293_p9 }
  0x31   : > { %1301 = shalt.err (!%p1298_p0)
}
  0x32   : > { %s1302_s7 = scalar_lea.vmem %s1507_s22, 2048  ;;  %s1390_s10 = smov [#allocation2]  }
  0x33   : > { %p1303_p1 = scmp.ne.s32.totalorder %s1507_s22, %s1302_s7  ;;  %s1307_s11 = sshll.u32 %s1390_s10, 4  ;;  %s1308_s11 = int_to_ptr.vmem [resolvable:$false] %s1307_s11 }
  0x34   : > { %s1309_s21 = scalar_lea.vmem %s1308_s11, 4096  ;;  %p1310_p2 = scmp.lt.s32.totalorder %s1507_s22, %s1308_s11 }
  0x35   : > { %p1305_p6 = pnand %p1303_p1, %p1291_p7  ;;  %p1311_p3 = scmp.lt.s32.totalorder %s1309_s21, %s1302_s7 }
  0x37   : > { %p1306_p5 = pneg %p1305_p6  ;;  %p1312_p4 = por %p1311_p3, %p1310_p2 }
  0x39   : > { %p1313_p8 = pnand %p1312_p4, %p1306_p5 }
  0x3b   : > { %1316 = shalt.err (!%p1313_p8)
}
  0x3c   : > { %1193 = dma.hbm_to_vmem [thread:$0]  (!%p1503_p11), %s1501_s17, 2048, %s1507_s22, %s1509_s25, %s1388_s28, %s1388_s28, %s1389_s29  }
  0x3d   : > { %p1690_p1 = scmp.ne.s32.totalorder %s1685_s20, 0 }
  0x3e   : > { %s1536_s26 = sand.u32 (!%p1690_p1), 1, %s1377_s13   ;;  %p1691_p4 = scmp.ne.s32.totalorder (!%p1690_p1), %s1683_s18, 0 }
  0x3f   : > { %171 = sbr.rel (%p1690_p1) target bundleno = 350 (0x15e), region = 32  ;;  %s896_s27 = sshll.u32 (!%p1690_p1), %s1536_s26, 7 }
  0x40   : > { %s174_s30 = scalar_lea.sflag (!%p1690_p1), [#allocation3], %s1536_s26  ;;  %s1542_s23 = scalar_lea.vmem (!%p1690_p1), [#allocation2], %s896_s27 }
  0x44   : > { %1360 = dma.done.wait (%p1691_p4), %s174_s30, 2048  }
  0x45   : > { %1362 = vsyncadd (%p1691_p4), %s174_s30, 4294965248  ;;  %p1692_p6 = scmp.eq.s32.totalorder %s1435_s16, 0 }
  0x47   : > { %1364 = dma.done.wait (%p1692_p6), [#allocation6], 1024   ;;  %p1693_p8 = pmov %p1692_p6 }
  0x48   : > { %v1239_v0 = vld [vmem:[#allocation5 + $0x38] sm:$0xff]   ;;  %v1240_v1 = vld [vmem:[#allocation5 + $0x30] sm:$0xff]   ;;  %v1241_v2 = vld [vmem:[#allocation5 + $0x28] sm:$0xff]   ;;  %s1587_s28 = scalar_lea.vmem [#allocation7], %s896_s27  ;;  %s994_s29 = sshll.u32 %s1435_s16, 11 }
  0x49   : > { %1366 = vsyncadd (%p1693_p8), [#allocation6], 4294966272  ;;  %1114 = vmatprep.subr.bf16.mxu0 %v1239_v0  ;;  %1162 = vmatprep.subr.bf16.mxu1 %v1239_v0  ;;  %v1242_v3 = vld [vmem:[#allocation5 + $0x20] sm:$0xff]   ;;  %v1243_v6 = vld [vmem:[#allocation5 + $0x18] sm:$0xff]   ;;  %s805_s17 = sshll.u32 %s1587_s28, 4  ;;  %s1626_s16 = scalar_lea.hbm %s1678_s3, %s994_s29  ;;  %s1628_s17 = int_to_ptr.vmem [resolvable:$true] %s805_s17 }
  0x4a   : > { %1115 = vmatpush3.bf16.msra.mxu0 %v1239_v0  ;;  %1170 = vmatpush3.bf16.msra.mxu1 %v1239_v0  ;;  %v1247_v4 = vld [vmem:[%s1542_s23] sm:$0xff]   ;;  %v1244_v7 = vld [vmem:[#allocation5 + $0x10] sm:$0xff]   ;;  %v1245_v8 = vld [vmem:[#allocation5 + $0x8] sm:$0xff]   ;;  %s792_s4 = scalar_lea.sflag [#allocation4], %s1536_s26  ;;  %s1317_s8 = scalar_lea.vmem %s1628_s17, 2048 }
  0x4b   : > { %1116 = vmatprep.subr.bf16.mxu0 %v1240_v1  ;;  %1163 = vmatprep.subr.bf16.mxu1 %v1240_v1  ;;  %v1248_v5 = vld [vmem:[%s1542_s23 + $0x40] sm:$0xff]   ;;  %v1249_v10 = vld [vmem:[%s1542_s23 + $0x8] sm:$0xff]   ;;  %v1251_v12 = vld [vmem:[%s1542_s23 + $0x10] sm:$0xff]   ;;  %p1318_p3 = scmp.ne.s32.totalorder %s1628_s17, %s1317_s8  ;;  %p1694_p11 = scmp.ne.s32.totalorder %s1688_s6, 0 }
  0x4c   : > { %1130 = vmatprep.mubr.bf16.mxu0 %v1247_v4  ;;  %1146 = vmatprep.mubr.bf16.mxu1 %v1248_v5  ;;  %v1246_v9 = vld [vmem:[#allocation5] sm:$0xff]   ;;  %v1250_v11 = vld [vmem:[%s1542_s23 + $0x48] sm:$0xff]   ;;  %v1252_v13 = vld [vmem:[%s1542_s23 + $0x50] sm:$0xff]   ;;  %s1391_s9 = smov [#allocation7]  }
  0x4d   : > { %v1253_v14 = vld [vmem:[%s1542_s23 + $0x18] sm:$0xff]   ;;  %v1255_v16 = vld [vmem:[%s1542_s23 + $0x20] sm:$0xff]   ;;  %v1257_v18 = vld [vmem:[%s1542_s23 + $0x28] sm:$0xff]   ;;  %p1319_p7 = pnand %p1318_p3, %p1694_p11  ;;  %s1321_s7 = sshll.u32 %s1391_s9, 4  ;;  %s1322_s7 = int_to_ptr.vmem [resolvable:$false] %s1321_s7 }
  0x4e   : > { %1117 = vmatpush3.bf16.msra.mxu0 %v1240_v1  ;;  %1171 = vmatpush3.bf16.msra.mxu1 %v1240_v1  ;;  %v1254_v15 = vld [vmem:[%s1542_s23 + $0x58] sm:$0xff]   ;;  %v1256_v17 = vld [vmem:[%s1542_s23 + $0x60] sm:$0xff]   ;;  %v1258_v19 = vld [vmem:[%s1542_s23 + $0x68] sm:$0xff]   ;;  %s1323_s10 = scalar_lea.vmem %s1322_s7, 4096  ;;  %p1324_p10 = scmp.lt.s32.totalorder %s1628_s17, %s1322_s7 }
  0x4f   : > { %1118 = vmatprep.subr.bf16.mxu0 %v1241_v2  ;;  %1164 = vmatprep.subr.bf16.mxu1 %v1241_v2  ;;  %v1259_v20 = vld [vmem:[%s1542_s23 + $0x30] sm:$0xff]   ;;  %v1261_v22 = vld [vmem:[%s1542_s23 + $0x38] sm:$0xff]   ;;  %v1571_v24 = vld [vmem:[%s1677_s2] ss:$0 sm:$0xff]  ;;  %p1320_p9 = pneg %p1319_p7  ;;  %p1325_p12 = scmp.lt.s32.totalorder %s1323_s10, %s1317_s8 }
  0x50   : > { %v1260_v21 = vld [vmem:[%s1542_s23 + $0x70] sm:$0xff]   ;;  %v1262_v23 = vld [vmem:[%s1542_s23 + $0x78] sm:$0xff]  }
  0x51   : > { %p1326_p13 = por %p1325_p12, %p1324_p10 }
  0x52   : > { %1119 = vmatpush3.bf16.msra.mxu0 %v1241_v2  ;;  %1172 = vmatpush3.bf16.msra.mxu1 %v1241_v2 }
  0x53   : > { %1120 = vmatprep.subr.bf16.mxu0 %v1242_v3  ;;  %1165 = vmatprep.subr.bf16.mxu1 %v1242_v3  ;;  %p1327_p0 = pnand %p1326_p13, %p1320_p9 }
  0x56   : > { %1121 = vmatpush3.bf16.msra.mxu0 %v1242_v3  ;;  %1173 = vmatpush3.bf16.msra.mxu1 %v1242_v3 }
  0x57   : > { %1122 = vmatprep.subr.bf16.mxu0 %v1243_v6  ;;  %1166 = vmatprep.subr.bf16.mxu1 %v1243_v6 }
  0x5a   : > { %1123 = vmatpush3.bf16.msra.mxu0 %v1243_v6  ;;  %1174 = vmatpush3.bf16.msra.mxu1 %v1243_v6 }
  0x5b   : > { %1124 = vmatprep.subr.bf16.mxu0 %v1244_v7  ;;  %1167 = vmatprep.subr.bf16.mxu1 %v1244_v7 }
  0x5e   : > { %1125 = vmatpush3.bf16.msra.mxu0 %v1244_v7  ;;  %1175 = vmatpush3.bf16.msra.mxu1 %v1244_v7 }
  0x5f   : > { %1126 = vmatprep.subr.bf16.mxu0 %v1245_v8  ;;  %1168 = vmatprep.subr.bf16.mxu1 %v1245_v8 }
  0x62   : > { %1127 = vmatpush3.bf16.msra.mxu0 %v1245_v8  ;;  %1176 = vmatpush3.bf16.msra.mxu1 %v1245_v8 }
  0x63   : > { %1128 = vmatprep.subr.bf16.mxu0 %v1246_v9  ;;  %1169 = vmatprep.subr.bf16.mxu1 %v1246_v9 }
  0x66   : > { %1129 = vmatpush3.bf16.msra.mxu0 %v1246_v9  ;;  %1177 = vmatpush3.bf16.msra.mxu1 %v1246_v9 }
  0x69   : > { %1131 = vmatmul.mubr.bf16.vlgmr.msra.gmra.mxu0 %v1249_v10  ;;  %1147 = vmatmul.mubr.bf16.vlgmr.msra.gmra.mxu1 %v1250_v11 }
  0x6a   : > { %1134 = vmatprep.mubr.bf16.mxu0 %v1251_v12  ;;  %1150 = vmatprep.mubr.bf16.mxu1 %v1252_v13 }
  0x71   : > { %1135 = vmatmul.mubr.bf16.gmra.mxu0 %v1253_v14  ;;  %1151 = vmatmul.mubr.bf16.gmra.mxu1 %v1254_v15 }
  0x72   : > { %1138 = vmatprep.mubr.bf16.mxu0 %v1255_v16  ;;  %1154 = vmatprep.mubr.bf16.mxu1 %v1256_v17 }
  0x79   : > { %1139 = vmatmul.mubr.bf16.gmra.mxu0 %v1257_v18  ;;  %1155 = vmatmul.mubr.bf16.gmra.mxu1 %v1258_v19 }
  0x7a   : > { %1142 = vmatprep.mubr.bf16.mxu0 %v1259_v20  ;;  %1158 = vmatprep.mubr.bf16.mxu1 %v1260_v21 }
  0x81   : > { %1143 = vmatmul.mubr.bf16.gmra.mxu0 %v1261_v22  ;;  %1159 = vmatmul.mubr.bf16.gmra.mxu1 %v1262_v23 }
 0x129   : > { %v1132_v25 = vpop.f32.mrf.mxu0  ;;  %v1148_v26 = vpop.f32.mrf.mxu1 }
 0x12a   : > { %v449_v27 = vadd.f32 %v1132_v25, %v1571_v24  ;;  %v513_v28 = vadd.f32 %v1148_v26, %v1571_v24 }
 0x12b   : > { %v440_v29 = vpop.f32.mrf.mxu0  ;;  %v504_v30 = vpop.f32.mrf.mxu1 }
 0x12c   : > { %v441_v31 = vadd.f32 %v1571_v24, %v440_v29  ;;  %v505_v32 = vadd.f32 %v1571_v24, %v504_v30  ;;  %v569_v35 = vmax.f32 %v449_v27, 0.0  ;;  %v585_v36 = vmax.f32 %v513_v28, 0.0 }
 0x12d   : > { %v1133_v33 = vpop.f32.mrf.mxu0  ;;  %v1149_v34 = vpop.f32.mrf.mxu1 }
 0x12e   : > { %v452_v37 = vadd.f32 %v1133_v33, %v1571_v24  ;;  %v516_v38 = vadd.f32 %v1149_v34, %v1571_v24  ;;  %v567_v41 = vmax.f32 %v441_v31, 0.0  ;;  %v583_v42 = vmax.f32 %v505_v32, 0.0 }
 0x12f   : > { %v443_v39 = vpop.f32.mrf.mxu0  ;;  %v507_v40 = vpop.f32.mrf.mxu1  ;;  %v601_v49 = vmin.f32 %v569_v35, 6.0  ;;  %v617_v50 = vmin.f32 %v585_v36, 6.0 }
 0x130   : > { %v444_v43 = vadd.f32 %v1571_v24, %v443_v39  ;;  %v508_v44 = vadd.f32 %v1571_v24, %v507_v40  ;;  %v570_v45 = vmax.f32 %v452_v37, 0.0  ;;  %v586_v46 = vmax.f32 %v516_v38, 0.0 }
 0x131   : > { %v1136_v47 = vpop.f32.mrf.mxu0  ;;  %v1152_v48 = vpop.f32.mrf.mxu1  ;;  %v599_v59 = vmin.f32 %v567_v41, 6.0  ;;  %v615_v60 = vmin.f32 %v583_v42, 6.0 }
 0x132   : > { %v568_v51 = vmax.f32 %v444_v43, 0.0  ;;  %v584_v52 = vmax.f32 %v508_v44, 0.0  ;;  %v602_v53 = vmin.f32 %v570_v45, 6.0  ;;  %v618_v54 = vmin.f32 %v586_v46, 6.0 }
 0x133   : > { %v465_v55 = vadd.f32 %v1136_v47, %v1571_v24  ;;  %v529_v56 = vadd.f32 %v1152_v48, %v1571_v24  ;;  %v456_v57 = vpop.f32.mrf.mxu0  ;;  %v520_v58 = vpop.f32.mrf.mxu1 }
 0x134   : > { %v600_v61 = vmin.f32 %v568_v51, 6.0  ;;  %v616_v62 = vmin.f32 %v584_v52, 6.0  ;;  %v1003_v63 = vpack.c.bf16 %v602_v53, %v601_v49  ;;  %v1043_v0 = vpack.c.bf16 %v618_v54, %v617_v50 }
 0x135   : > { %v457_v1 = vadd.f32 %v1571_v24, %v456_v57  ;;  %v521_v2 = vadd.f32 %v1571_v24, %v520_v58  ;;  %v1137_v3 = vpop.f32.mrf.mxu0  ;;  %v1153_v4 = vpop.f32.mrf.mxu1  ;;  %v573_v7 = vmax.f32 %v465_v55, 0.0  ;;  %v589_v8 = vmax.f32 %v529_v56, 0.0 }
 0x136   : > { %v998_v5 = vpack.c.bf16 %v600_v61, %v599_v59  ;;  %v1038_v6 = vpack.c.bf16 %v616_v62, %v615_v60  ;;  %1075 = vst [vmem:[%s1587_s28 + $0x8] sm:$0xff] %v1003_v63   ;;  %1083 = vst [vmem:[%s1587_s28 + $0x48] sm:$0xff] %v1043_v0   ;;  %v468_v9 = vadd.f32 %v1137_v3, %v1571_v24 }
 0x137   : > { %v532_v10 = vadd.f32 %v1153_v4, %v1571_v24  ;;  %v459_v11 = vpop.f32.mrf.mxu0  ;;  %v523_v12 = vpop.f32.mrf.mxu1  ;;  %v571_v13 = vmax.f32 %v457_v1, 0.0  ;;  %v587_v14 = vmax.f32 %v521_v2, 0.0  ;;  %v605_v26 = vmin.f32 %v573_v7, 6.0 }
 0x138   : > { %999 = vst [vmem:[%s1587_s28] sm:$0xff] %v998_v5   ;;  %1082 = vst [vmem:[%s1587_s28 + $0x40] sm:$0xff] %v1038_v6   ;;  %v460_v15 = vadd.f32 %v1571_v24, %v459_v11  ;;  %v524_v16 = vadd.f32 %v1571_v24, %v523_v12  ;;  %v574_v17 = vmax.f32 %v468_v9, 0.0  ;;  %v621_v27 = vmin.f32 %v589_v8, 6.0 }
 0x139   : > { %v590_v18 = vmax.f32 %v532_v10, 0.0  ;;  %v1140_v19 = vpop.f32.mrf.mxu0  ;;  %v1156_v20 = vpop.f32.mrf.mxu1  ;;  %v603_v32 = vmin.f32 %v571_v13, 6.0  ;;  %v619_v33 = vmin.f32 %v587_v14, 6.0 }
 0x13a   : > { %v572_v21 = vmax.f32 %v460_v15, 0.0  ;;  %v588_v22 = vmax.f32 %v524_v16, 0.0  ;;  %v481_v23 = vadd.f32 %v1140_v19, %v1571_v24  ;;  %v545_v25 = vadd.f32 %v1156_v20, %v1571_v24 }
 0x13b   : > { %v606_v28 = vmin.f32 %v574_v17, 6.0  ;;  %v622_v29 = vmin.f32 %v590_v18, 6.0  ;;  %v472_v30 = vpop.f32.mrf.mxu0  ;;  %v536_v31 = vpop.f32.mrf.mxu1 }
 0x13c   : > { %v604_v34 = vmin.f32 %v572_v21, 6.0  ;;  %v620_v35 = vmin.f32 %v588_v22, 6.0  ;;  %v473_v38 = vadd.f32 %v1571_v24, %v472_v30  ;;  %v537_v39 = vadd.f32 %v1571_v24, %v536_v31 }
 0x13d   : > { %v1013_v36 = vpack.c.bf16 %v606_v28, %v605_v26  ;;  %v1053_v37 = vpack.c.bf16 %v622_v29, %v621_v27  ;;  %v1141_v40 = vpop.f32.mrf.mxu0  ;;  %v1157_v41 = vpop.f32.mrf.mxu1  ;;  %v577_v44 = vmax.f32 %v481_v23, 0.0  ;;  %v593_v45 = vmax.f32 %v545_v25, 0.0 }
 0x13e   : > { %v1008_v42 = vpack.c.bf16 %v604_v34, %v603_v32  ;;  %v1048_v43 = vpack.c.bf16 %v620_v35, %v619_v33  ;;  %v484_v46 = vadd.f32 %v1141_v40, %v1571_v24  ;;  %v548_v47 = vadd.f32 %v1157_v41, %v1571_v24 }
 0x13f   : > { %1077 = vst [vmem:[%s1587_s28 + $0x18] sm:$0xff] %v1013_v36   ;;  %1085 = vst [vmem:[%s1587_s28 + $0x58] sm:$0xff] %v1053_v37   ;;  %v475_v48 = vpop.f32.mrf.mxu0  ;;  %v539_v49 = vpop.f32.mrf.mxu1  ;;  %v575_v50 = vmax.f32 %v473_v38, 0.0  ;;  %v591_v51 = vmax.f32 %v537_v39, 0.0  ;;  %v609_v58 = vmin.f32 %v577_v44, 6.0  ;;  %v625_v59 = vmin.f32 %v593_v45, 6.0 }
 0x140   : > { %1076 = vst [vmem:[%s1587_s28 + $0x10] sm:$0xff] %v1008_v42   ;;  %1084 = vst [vmem:[%s1587_s28 + $0x50] sm:$0xff] %v1048_v43   ;;  %v476_v52 = vadd.f32 %v1571_v24, %v475_v48  ;;  %v540_v53 = vadd.f32 %v1571_v24, %v539_v49  ;;  %v578_v54 = vmax.f32 %v484_v46, 0.0  ;;  %v594_v55 = vmax.f32 %v548_v47, 0.0 }
 0x141   : > { %v1144_v56 = vpop.f32.mrf.mxu0  ;;  %v1160_v57 = vpop.f32.mrf.mxu1  ;;  %v607_v4 = vmin.f32 %v575_v50, 6.0  ;;  %v623_v5 = vmin.f32 %v591_v51, 6.0 }
 0x142   : > { %v576_v60 = vmax.f32 %v476_v52, 0.0  ;;  %v592_v61 = vmax.f32 %v540_v53, 0.0  ;;  %v610_v62 = vmin.f32 %v578_v54, 6.0  ;;  %v626_v63 = vmin.f32 %v594_v55, 6.0 }
 0x143   : > { %v497_v0 = vadd.f32 %v1144_v56, %v1571_v24  ;;  %v561_v1 = vadd.f32 %v1160_v57, %v1571_v24  ;;  %v488_v2 = vpop.f32.mrf.mxu0  ;;  %v552_v3 = vpop.f32.mrf.mxu1 }
 0x144   : > { %v608_v6 = vmin.f32 %v576_v60, 6.0  ;;  %v624_v7 = vmin.f32 %v592_v61, 6.0  ;;  %v1023_v8 = vpack.c.bf16 %v610_v62, %v609_v58  ;;  %v1063_v9 = vpack.c.bf16 %v626_v63, %v625_v59 }
 0x145   : > { %v489_v10 = vadd.f32 %v1571_v24, %v488_v2  ;;  %v553_v11 = vadd.f32 %v1571_v24, %v552_v3  ;;  %v1145_v12 = vpop.f32.mrf.mxu0  ;;  %v1161_v13 = vpop.f32.mrf.mxu1  ;;  %v581_v16 = vmax.f32 %v497_v0, 0.0  ;;  %v597_v17 = vmax.f32 %v561_v1, 0.0 }
 0x146   : > { %v1018_v14 = vpack.c.bf16 %v608_v6, %v607_v4  ;;  %v1058_v15 = vpack.c.bf16 %v624_v7, %v623_v5  ;;  %1079 = vst [vmem:[%s1587_s28 + $0x28] sm:$0xff] %v1023_v8   ;;  %1087 = vst [vmem:[%s1587_s28 + $0x68] sm:$0xff] %v1063_v9   ;;  %v500_v18 = vadd.f32 %v1145_v12, %v1571_v24 }
 0x147   : > { %v564_v19 = vadd.f32 %v1161_v13, %v1571_v24  ;;  %v491_v20 = vpop.f32.mrf.mxu0  ;;  %v555_v21 = vpop.f32.mrf.mxu1  ;;  %v579_v22 = vmax.f32 %v489_v10, 0.0  ;;  %v595_v23 = vmax.f32 %v553_v11, 0.0  ;;  %v613_v31 = vmin.f32 %v581_v16, 6.0 }
 0x148   : > { %1078 = vst [vmem:[%s1587_s28 + $0x20] sm:$0xff] %v1018_v14   ;;  %1086 = vst [vmem:[%s1587_s28 + $0x60] sm:$0xff] %v1058_v15   ;;  %v492_v25 = vadd.f32 %v1571_v24, %v491_v20  ;;  %v556_v26 = vadd.f32 %v1571_v24, %v555_v21  ;;  %v582_v27 = vmax.f32 %v500_v18, 0.0  ;;  %v629_v32 = vmin.f32 %v597_v17, 6.0 }
 0x149   : > { %v598_v28 = vmax.f32 %v564_v19, 0.0  ;;  %v611_v35 = vmin.f32 %v579_v22, 6.0  ;;  %v627_v36 = vmin.f32 %v595_v23, 6.0 }
 0x14a   : > { %v580_v29 = vmax.f32 %v492_v25, 0.0  ;;  %v596_v30 = vmax.f32 %v556_v26, 0.0  ;;  %v614_v33 = vmin.f32 %v582_v27, 6.0 }
 0x14b   : > { %v630_v34 = vmin.f32 %v598_v28, 6.0 }
 0x14c   : > { %v612_v37 = vmin.f32 %v580_v29, 6.0  ;;  %v628_v24 = vmin.f32 %v596_v30, 6.0  ;;  %v1033_v38 = vpack.c.bf16 %v614_v33, %v613_v31 }
 0x14d   : > { %v1073_v39 = vpack.c.bf16 %v630_v34, %v629_v32 }
 0x14e   : > { %v1028_v40 = vpack.c.bf16 %v612_v37, %v611_v35  ;;  %v1068_v41 = vpack.c.bf16 %v628_v24, %v627_v36  ;;  %1081 = vst [vmem:[%s1587_s28 + $0x38] sm:$0xff] %v1033_v38  }
 0x14f   : > { %1089 = vst [vmem:[%s1587_s28 + $0x78] sm:$0xff] %v1073_v39  }
 0x150   : > { %1080 = vst [vmem:[%s1587_s28 + $0x30] sm:$0xff] %v1028_v40   ;;  %1088 = vst [vmem:[%s1587_s28 + $0x70] sm:$0xff] %v1068_v41  }
 0x151   : > { %1330 = shalt.err (!%p1327_p0)
}
 0x152   : > { %s1331_s11 = scalar_lea.hbm %s1626_s16, 2048  ;;  %s1335_s30 = scalar_lea.hbm %s1678_s3, 4096 }
 0x153   : > { %p1332_p5 = scmp.ne.s32.totalorder %s1626_s16, %s1331_s11  ;;  %p1336_p4 = scmp.lt.s32.totalorder %s1626_s16, %s1678_s3 }
 0x154   : > { %p1337_p6 = scmp.lt.s32.totalorder %s1335_s30, %s1331_s11 }
 0x155   : > { %p1333_p2 = pnand %p1332_p5, %p1694_p11 }
 0x156   : > { %p1338_p8 = por %p1337_p6, %p1336_p4 }
 0x157   : > { %p1334_p1 = pneg %p1333_p2 }
 0x159   : > { %p1339_p3 = pnand %p1338_p8, %p1334_p1 }
 0x15b   : > { %1342 = shalt.err (!%p1339_p3)
}
 0x15c   : > { %s1392_s20 = smov 64   ;;  %s1393_s28 = smov 4  }
 0x15d   : > { %1184 = dma.vmem_to_hbm [thread:$0]  (%p1694_p11), %s1628_s17, 2048, %s1626_s16, %s792_s4, %s1392_s20, %s1392_s20, %s1393_s28  }
 0x15e PF: > { %s820_s29 = sand.u32 1, %s1373_s12   ;;  %p1695_p7 = scmp.ne.s32.totalorder %s1684_s19, 0 }
 0x15f   : > { %p1696_p9 = scmp.ge.s32.totalorder %s1385_s15, 2  ;;  %s821_s22 = scalar_lea.sflag [#allocation4], %s820_s29 }
 0x161   : > { %p1195_p10 = pnand %p1696_p9, %p1695_p7 }
 0x163   : > { %p1196_p12 = pneg %p1195_p10 }
 0x165   : > { %1368 = dma.done.wait (%p1196_p12), %s821_s22, 2048  }
 0x166   : > { %1370 = vsyncadd (%p1196_p12), %s821_s22, 4294965248  ;;  %p17_p13 = scmp.ge.s32.totalorder %s1468_s24, 4   ;;  %s1697_s12 = smov %s1377_s13 }
 0x167   : > { %s1698_s13 = smov %s1381_s14  ;;  %s1699_s14 = smov %s1488_s5 }
 0x168   : > { %s1700_s15 = smov %s1468_s24  ;;  %19 = sbr.rel (!%p17_p13) target bundleno = 6 (0x6), region = 81 }
 0x16d   :  { %826 = vsyncpa [#allocation3], 1 }
 0x16e   :  { %828 = vsyncpa [#allocation3 + $0x1], 1 }
 0x16f   :  { %829 = vsyncpa [#allocation6], 1 }
 0x170   :  { %830 = vsyncpa [#allocation4], 1 }
 0x171   :  { %832 = vsyncpa [#allocation4 + $0x1], 1 }

</bundles_post_ra>
